<compile_context>
chip_gen: v5e
topology: v5e:2x2
jax: 0.10.0
libtpu: 0.0.40
codegen_flags: <defaults>
</compile_context>

<pallas_src>
import functools

import jax
import jax.numpy as jnp
from jax.experimental import pallas as pl
from jax.experimental.pallas import tpu as pltpu

EPS = 0.001  # module default


def _ls_ce_kernel(x_ref, tgt_ref, out_ref, acc_ref, *, n_total, eps, inv_n, inv_nc):
    i = pl.program_id(0)

    @pl.when(i == 0)
    def _():
        acc_ref[0] = jnp.float32(0.0)   # running sum of H_pq over valid rows
        acc_ref[1] = jnp.float32(0.0)   # running sum of log_probs over valid rows

    x = x_ref[...].astype(jnp.float32)          # (tile_n, C)
    tgt = tgt_ref[...]                          # (tile_n, 1) int32
    tn, c = x.shape

    # Numerically-stable per-row logsumexp (no log_probs materialization).
    m = jnp.max(x, axis=-1, keepdims=True)                  # (tn, 1)
    shifted = x - m                                         # (tn, C)
    lse = jnp.log(jnp.sum(jnp.exp(shifted), axis=-1, keepdims=True))  # (tn, 1)

    # Gather shifted[i, target[i]] via masked sum (no one-hot float multiply).
    col = jax.lax.broadcasted_iota(jnp.int32, (tn, c), 1)
    shifted_tgt = jnp.sum(jnp.where(col == tgt, shifted, 0.0),
                          axis=-1, keepdims=True)           # (tn, 1)
    h_pq = lse - shifted_tgt                                # -log p[target]

    # sum_j log_probs[i, j] = sum_j shifted[i, j] - C * lse[i]
    row_logprob_sum = jnp.sum(shifted, axis=-1, keepdims=True) - jnp.float32(c) * lse

    # Mask rows of the (possibly partial) tail tile.
    row = jax.lax.broadcasted_iota(jnp.int32, (tn, 1), 0)
    valid = (i * tn + row) < n_total
    h_pq = jnp.where(valid, h_pq, 0.0)
    row_logprob_sum = jnp.where(valid, row_logprob_sum, 0.0)

    acc_ref[0] += jnp.sum(h_pq)
    acc_ref[1] += jnp.sum(row_logprob_sum)

    @pl.when(i == pl.num_programs(0) - 1)
    def _():
        h_uq = -acc_ref[1] * jnp.float32(inv_nc)            # -mean(log_probs)
        out_ref[0, 0] = (jnp.float32(1.0 - eps) * acc_ref[0] * jnp.float32(inv_n)
                         + jnp.float32(eps) * h_uq)


def _choose_tile_n(n, c, itemsize):
    """~4 MiB per input buffer (Pallas double-buffers), multiple of 8 rows."""
    target_bytes = 4 * 1024 * 1024
    tile = target_bytes // max(1, c * itemsize)
    tile = int(max(8, min(tile, 1024)))
    tile = (tile // 8) * 8
    if tile >= n:
        return n          # single full-extent block (always a legal block shape)
    return max(8, tile)


def label_smoothing_cross_entropy(x, target, eps=EPS, tile_n=None):
    """x: (N, C) float logits (f32 or bf16); target: (N,) int labels -> scalar f32."""
    n, c = x.shape
    if tile_n is None:
        tile_n = _choose_tile_n(n, c, x.dtype.itemsize)
    tile_n = min(int(tile_n), n)
    if tile_n < n and tile_n % 8 != 0:
        raise ValueError("tile_n must be a multiple of 8 when tiling the batch axis")

    grid = (pl.cdiv(n, tile_n),)
    tgt2d = target.astype(jnp.int32).reshape(n, 1)

    kernel = functools.partial(
        _ls_ce_kernel,
        n_total=n,
        eps=float(eps),
        inv_n=1.0 / float(n),              # trace-time reciprocals (full precision)
        inv_nc=1.0 / (float(n) * float(c)),
    )

    out = pl.pallas_call(
        kernel,
        out_shape=jax.ShapeDtypeStruct((1, 1), jnp.float32),
        grid=grid,
        in_specs=[
            pl.BlockSpec((tile_n, c), lambda i: (i, 0)),   # logits strip (bf16 ok)
            pl.BlockSpec((tile_n, 1), lambda i: (i, 0)),   # labels strip
        ],
        out_specs=pl.BlockSpec(memory_space=pltpu.SMEM),    # scalar result
        scratch_shapes=[pltpu.SMEM((2,), jnp.float32)],     # running partial sums
        compiler_params=pltpu.CompilerParams(
            dimension_semantics=("arbitrary",),             # accumulating axis
            vmem_limit_bytes=32 * 1024 * 1024,              # safe on v5e/v6e/v7x
        ),
    )(x, tgt2d)
    return out[0, 0]


def _reference(x, target):
    log_probs = jax.nn.log_softmax(x.astype(jnp.float32), axis=-1)
    h_pq = -jnp.take_along_axis(log_probs, target[:, None], axis=-1)[:, 0]
    h_uq = -jnp.mean(log_probs)
    loss = (1.0 - EPS) * h_pq + EPS * h_uq
    return jnp.mean(loss)


if __name__ == "__main__":
    key = jax.random.PRNGKey(0)
    kx, kt = jax.random.split(key)

    # Small shapes: batch=20 (not a multiple of the 8-row tile -> exercises the
    # masked tail-tile path), num_classes=32.
    N, C = 20, 32
    x = jax.random.normal(kx, (N, C), dtype=jnp.float32)
    target = jax.random.randint(kt, (N,), 0, C, dtype=jnp.int32)

    # Multi-step grid (tile of 8 rows -> 3 grid steps, last one partially masked).
    loss_tiled = label_smoothing_cross_entropy(x, target, tile_n=8)
    # Auto tile selection (single full block at this toy size).
    loss_auto = label_smoothing_cross_entropy(x, target)
    jax.block_until_ready((loss_tiled, loss_auto))

    ref = _reference(x, target)
    assert jnp.allclose(loss_tiled, ref, atol=1e-5, rtol=1e-5), (loss_tiled, ref)
    assert jnp.allclose(loss_auto, ref, atol=1e-5, rtol=1e-5), (loss_auto, ref)

    # bf16 logits path (halves HBM traffic; kernel upcasts internally).
    x_bf16 = x.astype(jnp.bfloat16)
    loss_bf16 = label_smoothing_cross_entropy(x_bf16, target, tile_n=8)
    jax.block_until_ready(loss_bf16)
    ref_bf16 = _reference(x_bf16.astype(jnp.float32), target)
    assert jnp.allclose(loss_bf16, ref_bf16, atol=1e-4, rtol=1e-4), (loss_bf16, ref_bf16)

    print("KERNEL_OK")
</pallas_src>

<mosaic_0001>
module attributes {stable_mosaic.version = 11 : i64} {
  func.func @_ls_ce_kernel(%arg0: i32, %arg1: memref<8x32xf32, #tpu.memory_space<vmem>>, %arg2: memref<8x1xi32, #tpu.memory_space<vmem>>, %arg3: memref<1x1xf32, #tpu.memory_space<smem>>, %arg4: memref<2xf32, #tpu.memory_space<smem>>) attributes {dimension_semantics = [#tpu.dimension_semantics<arbitrary>], iteration_bounds = array<i64: 3>, scalar_prefetch = 0 : i64, scratch_operands = 1 : i64, tpu.core_type = #tpu.core_type<tc>, window_params = [{transform_indices = @transform_0, window_bounds = array<i64: 8, 32>}, {transform_indices = @transform_1, window_bounds = array<i64: 8, 1>}, {transform_indices = @transform_2, window_bounds = array<i64: 1, 1>}]} {
    %c0_i32 = arith.constant 0 : i32
    %0 = arith.cmpi eq, %arg0, %c0_i32 : i32
    %1 = arith.extui %0 : i1 to i32
    %c0_i32_0 = arith.constant 0 : i32
    %2 = arith.cmpi ne, %1, %c0_i32_0 : i32
    scf.if %2 {
      %cst_17 = arith.constant 0.000000e+00 : f32
      %c0_18 = arith.constant 0 : index
      %53 = memref.load %arg4[%c0_18] : memref<2xf32, #tpu.memory_space<smem>>
      memref.store %cst_17, %arg4[%c0_18] : memref<2xf32, #tpu.memory_space<smem>>
      %cst_19 = arith.constant 0.000000e+00 : f32
      %c1_20 = arith.constant 1 : index
      %54 = memref.load %arg4[%c1_20] : memref<2xf32, #tpu.memory_space<smem>>
      memref.store %cst_19, %arg4[%c1_20] : memref<2xf32, #tpu.memory_space<smem>>
    } else {
    }
    %c0 = arith.constant 0 : index
    %c0_1 = arith.constant 0 : index
    %3 = vector.load %arg1[%c0, %c0_1] : memref<8x32xf32, #tpu.memory_space<vmem>>, vector<8x32xf32>
    %c0_2 = arith.constant 0 : index
    %c0_3 = arith.constant 0 : index
    %4 = vector.load %arg2[%c0_2, %c0_3] : memref<8x1xi32, #tpu.memory_space<vmem>>, vector<8x1xi32>
    %cst = arith.constant dense<0xFF800000> : vector<8xf32>
    %5 = vector.multi_reduction <maximumf>, %3, %cst [1] : vector<8x32xf32> to vector<8xf32>
    %6 = vector.shape_cast %5 : vector<8xf32> to vector<8x1xf32>
    %7 = vector.broadcast %6 : vector<8x1xf32> to vector<8x32xf32>
    %8 = arith.subf %3, %7 : vector<8x32xf32>
    %9 = math.exp %8 : vector<8x32xf32>
    %cst_4 = arith.constant dense<0.000000e+00> : vector<8xf32>
    %10 = vector.multi_reduction <add>, %9, %cst_4 [1] : vector<8x32xf32> to vector<8xf32>
    %11 = vector.shape_cast %10 : vector<8xf32> to vector<8x1xf32>
    %12 = math.log %11 : vector<8x1xf32>
    %13 = tpu.iota {dimensions = array<i32: 1>} : vector<8x32xi32>
    %14 = vector.broadcast %4 : vector<8x1xi32> to vector<8x32xi32>
    %15 = arith.cmpi eq, %13, %14 : vector<8x32xi32>
    %cst_5 = arith.constant 0.000000e+00 : f32
    %16 = vector.broadcast %cst_5 : f32 to vector<8x32xf32>
    %17 = arith.select %15, %8, %16 : vector<8x32xi1>, vector<8x32xf32>
    %cst_6 = arith.constant dense<0.000000e+00> : vector<8xf32>
    %18 = vector.multi_reduction <add>, %17, %cst_6 [1] : vector<8x32xf32> to vector<8xf32>
    %19 = vector.shape_cast %18 : vector<8xf32> to vector<8x1xf32>
    %20 = arith.subf %12, %19 : vector<8x1xf32>
    %cst_7 = arith.constant dense<0.000000e+00> : vector<8xf32>
    %21 = vector.multi_reduction <add>, %8, %cst_7 [1] : vector<8x32xf32> to vector<8xf32>
    %22 = vector.shape_cast %21 : vector<8xf32> to vector<8x1xf32>
    %cst_8 = arith.constant 3.200000e+01 : f32
    %23 = vector.broadcast %cst_8 : f32 to vector<8x1xf32>
    %24 = arith.mulf %23, %12 : vector<8x1xf32>
    %25 = arith.subf %22, %24 : vector<8x1xf32>
    %26 = tpu.iota {dimensions = array<i32: 0>} : vector<8x1xi32>
    %c8_i32 = arith.constant 8 : i32
    %27 = arith.muli %arg0, %c8_i32 : i32
    %28 = vector.broadcast %27 : i32 to vector<8x1xi32>
    %29 = arith.addi %28, %26 : vector<8x1xi32>
    %c20_i32 = arith.constant 20 : i32
    %30 = vector.broadcast %c20_i32 : i32 to vector<8x1xi32>
    %31 = arith.cmpi slt, %29, %30 : vector<8x1xi32>
    %cst_9 = arith.constant 0.000000e+00 : f32
    %32 = vector.broadcast %cst_9 : f32 to vector<8x1xf32>
    %33 = arith.select %31, %20, %32 : vector<8x1xi1>, vector<8x1xf32>
    %cst_10 = arith.constant 0.000000e+00 : f32
    %34 = vector.broadcast %cst_10 : f32 to vector<8x1xf32>
    %35 = arith.select %31, %25, %34 : vector<8x1xi1>, vector<8x1xf32>
    %c0_11 = arith.constant 0 : index
    %36 = memref.load %arg4[%c0_11] : memref<2xf32, #tpu.memory_space<smem>>
    %37 = vector.shape_cast %33 : vector<8x1xf32> to vector<1x8x1xf32>
    %cst_12 = arith.constant dense<0.000000e+00> : vector<1xf32>
    %38 = vector.multi_reduction <add>, %37, %cst_12 [1, 2] : vector<1x8x1xf32> to vector<1xf32>
    %39 = vector.shape_cast %38 : vector<1xf32> to vector<1x1x1xf32>
    %40 = vector.extract %39[0, 0, 0] : f32 from vector<1x1x1xf32>
    %41 = arith.addf %36, %40 : f32
    %c0_13 = arith.constant 0 : index
    %42 = memref.load %arg4[%c0_13] : memref<2xf32, #tpu.memory_space<smem>>
    memref.store %41, %arg4[%c0_13] : memref<2xf32, #tpu.memory_space<smem>>
    %c1 = arith.constant 1 : index
    %43 = memref.load %arg4[%c1] : memref<2xf32, #tpu.memory_space<smem>>
    %44 = vector.shape_cast %35 : vector<8x1xf32> to vector<1x8x1xf32>
    %cst_14 = arith.constant dense<0.000000e+00> : vector<1xf32>
    %45 = vector.multi_reduction <add>, %44, %cst_14 [1, 2] : vector<1x8x1xf32> to vector<1xf32>
    %46 = vector.shape_cast %45 : vector<1xf32> to vector<1x1x1xf32>
    %47 = vector.extract %46[0, 0, 0] : f32 from vector<1x1x1xf32>
    %48 = arith.addf %43, %47 : f32
    %c1_15 = arith.constant 1 : index
    %49 = memref.load %arg4[%c1_15] : memref<2xf32, #tpu.memory_space<smem>>
    memref.store %48, %arg4[%c1_15] : memref<2xf32, #tpu.memory_space<smem>>
    %c2_i32 = arith.constant 2 : i32
    %50 = arith.cmpi eq, %arg0, %c2_i32 : i32
    %51 = arith.extui %50 : i1 to i32
    %c0_i32_16 = arith.constant 0 : i32
    %52 = arith.cmpi ne, %51, %c0_i32_16 : i32
    scf.if %52 {
      %c1_17 = arith.constant 1 : index
      %53 = memref.load %arg4[%c1_17] : memref<2xf32, #tpu.memory_space<smem>>
      %cst_18 = arith.constant 0.000000e+00 : f32
      %54 = arith.subf %cst_18, %53 : f32
      %cst_19 = arith.constant 1.562500e-03 : f32
      %55 = arith.mulf %54, %cst_19 : f32
      %c0_20 = arith.constant 0 : index
      %56 = memref.load %arg4[%c0_20] : memref<2xf32, #tpu.memory_space<smem>>
      %cst_21 = arith.constant 9.990000e-01 : f32
      %57 = arith.mulf %cst_21, %56 : f32
      %cst_22 = arith.constant 5.000000e-02 : f32
      %58 = arith.mulf %57, %cst_22 : f32
      %cst_23 = arith.constant 1.000000e-03 : f32
      %59 = arith.mulf %cst_23, %55 : f32
      %60 = arith.addf %58, %59 : f32
      %c0_24 = arith.constant 0 : index
      %c0_25 = arith.constant 0 : index
      %61 = memref.load %arg3[%c0_24, %c0_25] : memref<1x1xf32, #tpu.memory_space<smem>>
      memref.store %60, %arg3[%c0_24, %c0_25] : memref<1x1xf32, #tpu.memory_space<smem>>
    } else {
    }
    return
  }
  func.func @transform_0(%arg0: i32) -> (i32, i32) {
    %c0_i32 = arith.constant 0 : i32
    %c0_i32_0 = arith.constant 0 : i32
    return %arg0, %c0_i32 : i32, i32
  }
  func.func @transform_1(%arg0: i32) -> (i32, i32) {
    %c0_i32 = arith.constant 0 : i32
    %c0_i32_0 = arith.constant 0 : i32
    return %arg0, %c0_i32 : i32, i32
  }
  func.func @transform_2(%arg0: i32) -> (i32, i32) {
    %c0_i32 = arith.constant 0 : i32
    %c0_i32_0 = arith.constant 0 : i32
    %c0_i32_1 = arith.constant 0 : i32
    return %c0_i32, %c0_i32_0 : i32, i32
  }
}

</mosaic_0001>

<bundles_post_ra>
// kernel: tpu_custom_call.1
= control target key start
LH: loop header
LB: loop body
LE: loop exit
PB: predicated region body
PF: predicated region fallthrough
CT: control target
= control target key end

     0   :  { %7 = vsyncpa [#allocation4], 0  ;;  %s384_s9 = smov 0   ;;  %s415_s0 = inlined_call_operand.vmem [shape: f32[20,32], index: 0, kind: input, shape index: {}]   ;;  %s416_s1 = inlined_call_operand.vmem [shape: s32[20,1], index: 1, kind: input, shape index: {}]   ;;  %s417_s2 = inlined_call_operand.hbm [shape: f32[1,1], index: 2, kind: output, shape index: {}]  }
   0x1 LB: > { %s390_s10 = sadd.s32 4294967295, %s364_s9   ;;  %p295_p0 = scmp.ge.s32.totalorder %s364_s9, 1  ;;  %s364_s9 = sphi %s384_s9, %s13_s9  }
   0x2   : > { %p116_p1 = scmp.lt.s32.totalorder %s364_s9, 4 }
   0x4   : > { %p117_p2 = pnand %p295_p0, %p116_p1 }
   0x5   : > { %p136_p3 = scmp.lt.s32.totalorder (!%p117_p2), %s390_s10, 2  ;;  %s299_s19 = sshll.u32 (!%p117_p2), %s390_s10, 3 }
   0x6   : > { %120 = sbr.rel (%p117_p2) target bundleno = 470 (0x1d6), region = 28  ;;  %p320_p4 = scmp.eq.s32.totalorder (!%p117_p2), %s390_s10, 0 }
   0x7   : > { %s367_s20 = smov (!%p117_p2), 0.0   ;;  %s239_s4 = sshll.u32 (!%p117_p2), %s417_s2, 4  ;;  %s240_s4 = int_to_ptr.hbm [resolvable:$true] %s239_s4 }
   0x8   : > { %p321_p5 = scmp.eq.s32.totalorder (!%p117_p2), %s390_s10, 2  ;;  %s368_s8 = smov (!%p117_p2), [#allocation3]  }
   0xb   : > { %v366_v0 = vmov 0   ;;  %s137_s11 = scalar_select %p136_p3, %s390_s10, 2  ;;  %vm154_vm0 = vcmask 261120   ;;  %v166_v10 = vlaneseq  ;;  %v185_v17 = vstv %s299_s19 }
   0xc   : > { %335 = vset.pattern.permute.xlu0 %v366_v0  ;;  %vm191_vm3 = vcmask 7168   ;;  %312 = sst [smem:[#allocation2]] (%p320_p4), %s367_s20 }
   0xd   : > { %s296_s12 = sshll.u32 %s137_s11, 3  ;;  %v167_v11 = vand.u32 127, %v166_v10  ;;  %v183_v16 = vshrl.u32 %v166_v10, 7  ;;  %313 = sst [smem:[#allocation2 + $0x1]] (%p320_p4), %s367_s20 }
   0xe   : > { %s139_s15 = scalar_lea.vmem %s415_s0, %s296_s12  ;;  %s143_s18 = scalar_lea.vmem %s416_s1, %s296_s12 }
   0xf   : > { %v152_v1 = vld [vmem:[%s139_s15] sm:$0xff]  ;;  %v186_v18 = vadd.s32 %v185_v17, %v183_v16  ;;  %s190_s21 = sld [smem:[#allocation2]] }
  0x10   : > { %v155_v2 = vsel %vm154_vm0, %v152_v1, -inf  ;;  %v153_v3 = vld [vmem:[%s143_s18] sm:$0xff]  ;;  %s300_s22 = sld [smem:[#allocation2 + $0x1]] }
  0x11   : > { %156 = vmax.xlane.f32.xlu0 %v155_v2  ;;  %vm187_vm2 = vcmp.lt.s32.totalorder %v186_v18, 20 }
  0x25   : > { %169 = vperm.xlu0 %335, %v153_v3  }
  0x84   : > { %v157_v4 = vpop.xlane.xlu0 %156 }
  0x85   : > { %v158_v5 = vsub.f32 %v152_v1, %v157_v4 }
  0x87   : > { %v159_v6 = vmul.f32 1.442695, %v158_v5  ;;  %v177_v7 = vsel %vm154_vm0, %v158_v5, 0.0 }
  0x88   : > { %178 = vadd.xlane.f32.xlu2 %v177_v7 }
  0x89   : > { %336 = vpow2.f32 %v159_v6 }
  0x8f   : > { %v337_v8 = vpop.eup %336 }
  0x90   : > { %v161_v9 = vsel %vm154_vm0, %v337_v8, 0.0 }
  0x91   : > { %162 = vadd.xlane.f32.xlu1 %v161_v9 }
  0x97   : > { %v170_v12 = vpop.permute.xlu0 %169 }
  0x98   : > { %vm171_vm1 = vcmp.eq.s32.totalorder %v167_v11, %v170_v12 }
  0x99   : > { %v172_v13 = vsel %vm171_vm1, %v158_v5, 0.0 }
  0x9a   : > { %v173_v14 = vsel %vm154_vm0, %v172_v13, 0.0 }
  0x9b   : > { %174 = vadd.xlane.f32.xlu1 %v173_v14 }
  0xfb   : > { %v179_v23 = vpop.xlane.xlu2 %178 }
 0x104   : > { %v163_v15 = vpop.xlane.xlu1 %162 }
 0x105   : > { %338 = vlog2.f32 %v163_v15 }
 0x10b   : > { %v339_v19 = vpop.eup %338 }
 0x10c   : > { %v165_v20 = vmul.f32 0.6931472, %v339_v19 }
 0x10e   : > { %v180_v21 = vmul.f32 32.0, %v165_v20  ;;  %v175_v22 = vpop.xlane.xlu1 %174 }
 0x10f   : > { %v176_v24 = vsub.f32 %v165_v20, %v175_v22 }
 0x110   : > { %v181_v25 = vsub.f32 %v179_v23, %v180_v21 }
 0x111   : > { %v188_v26 = vsel %vm187_vm2, %v176_v24, 0.0 }
 0x112   : > { %v192_v27 = vsel %vm191_vm3, %v188_v26, 0.0  ;;  %v189_v28 = vsel %vm187_vm2, %v181_v25, 0.0 }
 0x113   : > { %193 = vadd.xlane.f32.xlu2 %v192_v27  ;;  %v206_v29 = vsel %vm191_vm3, %v189_v28, 0.0 }
 0x114   : > { %207 = vadd.xlane.f32.xlu1 %v206_v29 }
 0x186   : > { %v194_v30 = vpop.xlane.xlu2 %193 }
 0x187   : > { %v195_v31 = vrot.slane %v194_v30, 4  ;;  %v208_v32 = vpop.xlane.xlu1 %207 }
 0x188   : > { %v209_v33 = vrot.slane %v208_v32, 4 }
 0x189   : > { %v196_v34 = vadd.f32 %v195_v31, %v194_v30 }
 0x18a   : > { %v210_v35 = vadd.f32 %v209_v33, %v208_v32 }
 0x18b   : > { %v197_v36 = vrot.slane %v196_v34, 2 }
 0x18c   : > { %v211_v37 = vrot.slane %v210_v35, 2 }
 0x18d   : > { %v198_v38 = vadd.f32 %v197_v36, %v196_v34 }
 0x18e   : > { %v212_v39 = vadd.f32 %v211_v37, %v210_v35 }
 0x18f   : > { %v199_v40 = vrot.slane %v198_v38, 1 }
 0x190   : > { %v213_v41 = vrot.slane %v212_v39, 1 }
 0x191   : > { %v200_v42 = vadd.f32 %v199_v40, %v198_v38 }
 0x192   : > { %v214_v43 = vadd.f32 %v213_v41, %v212_v39 }
 0x193   : > { %307 = vpush %v200_v42 }
 0x194   : > { %309 = vpush %v214_v43 }
 0x1c4   : > { %s308_s23 = spop %307 }
 0x1c5   : > { %s202_s24 = sadd.f32 %s308_s23, %s190_s21  ;;  %s310_s25 = spop %309 }
 0x1c6   : > { %s216_s26 = sadd.f32 %s310_s25, %s300_s22 }
 0x1c7   : > { %204 = sst [smem:[#allocation2]] %s202_s24  ;;  %s227_s27 = smul.f32 0.999, %s202_s24 }
 0x1c8   : > { %218 = sst [smem:[#allocation2 + $0x1]] %s216_s26 }
 0x1c9   : > { %s224_s28 = ssub.f32 0.0, %s216_s26  ;;  %s228_s5 = smul.f32 0.05, %s227_s27 }
 0x1cb   : > { %s225_s29 = smul.f32 0.0015625, %s224_s28 }
 0x1cd   : > { %s229_s6 = smul.f32 0.001, %s225_s29 }
 0x1cf   : > { %s230_s7 = sadd.f32 %s229_s6, %s228_s5 }
 0x1d1   : > { %315 = sst [smem:[#allocation3]] (%p321_p5), %s230_s7 }
 0x1d2   : > { %317 = dma.smem_to_hbm (%p321_p5), %s368_s8, 16, %s240_s4, [#allocation4]  }
 0x1d3   : > { %359 = dma.done.wait (%p321_p5), [#allocation4], 16  }
 0x1d4   : > { %361 = vsyncadd (%p321_p5), [#allocation4], 4294967280 }
 0x1d5   : > { %248 = sfence }
 0x1d6 PF: > { %s13_s9 = sadd.s32 1, %s364_s9  }
 0x1d7   : > { %p10_p6 = scmp.ge.s32.totalorder %s13_s9, 5  }
 0x1d9   :  { %12 = sbr.rel (!%p10_p6) target bundleno = 1 (0x1), region = 71 }
 0x1de   :  { %254 = vsyncpa [#allocation4], 1 }
 0x1df   :  { %256 = vsyncpa [#allocation4 + $0x1], 1 }

</bundles_post_ra>
